<compile_context>
chip_gen: v7x
topology: tpu7x:2x2x1
jax: 0.10.0
libtpu: 0.0.40
codegen_flags: <defaults>
</compile_context>

<pallas_src>
import jax
import jax.numpy as jnp
from jax import lax
from jax.experimental import pallas as pl
from jax.experimental.pallas import tpu as pltpu


def _image_gradient_kernel(x_ref, gx_ref, gy_ref, sp_ref):
    # x_ref : (NB, 3, H, W)   unpadded input block
    # gx/gy : (NB, 3, H, W)   output blocks
    # sp_ref: (NB, H+2, W+2)  VMEM scratch: zero-padded channel sum
    NB, _, H, W = x_ref.shape

    # Channel collapse (weights identical across all (out,in) pairs).
    s = jnp.sum(x_ref[...], axis=1)                   # (NB, H, W)

    # Zero only the 1-pixel halo ring; the interior is fully overwritten below.
    # (Do NOT gate this on program_id==0: with the "parallel" axis split across
    #  TensorCores on v7x, the second core never executes step 0.)
    sp_ref[:, 0:1, :] = jnp.zeros((NB, 1, W + 2), jnp.float32)
    sp_ref[:, H + 1:H + 2, :] = jnp.zeros((NB, 1, W + 2), jnp.float32)
    sp_ref[:, :, 0:1] = jnp.zeros((NB, H + 2, 1), jnp.float32)
    sp_ref[:, :, W + 1:W + 2] = jnp.zeros((NB, H + 2, 1), jnp.float32)

    # Interior store: zero-padded channel sum lives wholly in VMEM (no HBM pad).
    # TODO(synk): a 128-lane-aligned halo layout (scratch width 128+W+pad) would make
    # this an unmasked aligned store; skipped to keep the proven access pattern.
    sp_ref[:, 1:H + 1, 1:W + 1] = s

    top = sp_ref[:, 0:H, :]                           # (NB, H, W+2)
    mid = sp_ref[:, 1:H + 1, :]
    bot = sp_ref[:, 2:H + 2, :]

    # Separable Sobel:
    #   Gx = [1,2,1]^T (vertical)  (x)  [1,0,-1] (horizontal)
    #   Gy = [1,0,-1]^T (vertical) (x)  [1,2,1]  (horizontal)
    v = (top + 2.0 * mid) + bot                       # vertical smooth (NB, H, W+2)
    d = top - bot                                     # vertical diff   (NB, H, W+2)

    gx = v[:, :, 0:W] - v[:, :, 2:W + 2]                              # (NB, H, W)
    gy = (d[:, :, 0:W] + 2.0 * d[:, :, 1:W + 1]) + d[:, :, 2:W + 2]   # (NB, H, W)

    # Contractual 3x channel duplication; per-channel stores avoid holding two
    # full (NB,3,H,W) broadcast temporaries live at once.
    for o in range(3):
        gx_ref[:, o, :, :] = gx
        gy_ref[:, o, :, :] = gy


def image_gradient(x, *, batch_block=None, vmem_fraction=0.75):
    """x: (N, 3, H, W) float32 -> (G_x, G_y), each (N, 3, H, W) float32."""
    N, C, H, W = x.shape
    assert C == 3, "ImageGradient expects 3 input channels"
    x = x.astype(jnp.float32)

    # ---- generation-aware VMEM sizing (v5e/v6e: 128 MiB, v7x: 64 MiB/core) ----
    try:
        vmem_cap = int(pltpu.get_tpu_info().vmem_capacity_bytes)
        if vmem_cap < 16 * 1024 * 1024:
            raise ValueError("implausible VMEM capacity")
    except Exception:
        vmem_cap = 64 * 1024 * 1024          # conservative fallback (v7x per-core)
    vmem_limit = min(int(vmem_fraction * vmem_cap), 96 * 1024 * 1024)
    vmem_limit = max(vmem_limit, 32 * 1024 * 1024)

    # Per-image VMEM footprint of one pipeline stage: input + 2 outputs
    # (double-buffered by the pipeline) + scratch + an allowance for the traced
    # body's intermediates (s/top/mid/bot/v/d/gx/gy).
    bytes_blocks = 4 * 3 * H * W * (1 + 2) * 2            # 72*H*W
    bytes_scratch = 4 * (H + 2) * (W + 2)
    bytes_temps = 4 * 8 * (H + 2) * (W + 2)
    per_img = bytes_blocks + bytes_scratch + bytes_temps

    if batch_block is None:
        budget = int(0.85 * vmem_limit)                    # headroom for compiler scratch
        cap_vmem = max(1, budget // per_img)
        cap_cores = max(1, N // 2)                         # >=2 grid steps for v7x megacore
        batch_block = int(max(1, min(cap_vmem, cap_cores, N)))
    NB = int(batch_block)
    assert NB >= 1
    # TODO(synk): very large frames (>= ~1 Mpx, e.g. 1080p) additionally need an H-tiled
    # grid axis with a 1-row halo (memory_space=pl.ANY + manual pltpu.make_async_copy)
    # to fit v7x's 64 MiB VMEM.
    # TODO(synk): if production W is small or not a multiple of 128, repack the output
    # presentation lane-dense (e.g. (N,3,H*W) wrapper-side reshape) to avoid masked stores.

    grid = (pl.cdiv(N, NB),)                               # ragged tail block is masked

    out_shape = (
        jax.ShapeDtypeStruct((N, 3, H, W), jnp.float32),
        jax.ShapeDtypeStruct((N, 3, H, W), jnp.float32),
    )
    cost = pl.CostEstimate(
        flops=10 * N * H * W,
        transcendentals=0,
        bytes_accessed=9 * N * H * W * 4,                  # 3 in + 6 out channels, f32
    )
    return pl.pallas_call(
        _image_gradient_kernel,
        out_shape=out_shape,
        grid=grid,
        in_specs=[pl.BlockSpec((NB, 3, H, W), lambda b: (b, 0, 0, 0))],
        out_specs=(
            pl.BlockSpec((NB, 3, H, W), lambda b: (b, 0, 0, 0)),
            pl.BlockSpec((NB, 3, H, W), lambda b: (b, 0, 0, 0)),
        ),
        scratch_shapes=[pltpu.VMEM((NB, H + 2, W + 2), jnp.float32)],
        compiler_params=pltpu.CompilerParams(
            dimension_semantics=("parallel",),
            vmem_limit_bytes=int(vmem_limit)),
        cost_estimate=cost,
    )(x)


def _reference(x):
    """Pure-JAX reference: the literal conv2d with the module's fixed weights."""
    sobel_x = jnp.array([[1., 0., -1.], [2., 0., -2.], [1., 0., -1.]], jnp.float32)
    sobel_y = jnp.array([[1., 2., 1.], [0., 0., 0.], [-1., -2., -1.]], jnp.float32)
    w_x = jnp.broadcast_to(sobel_x, (3, 3, 3, 3))   # (out=3, in=3, 3, 3)
    w_y = jnp.broadcast_to(sobel_y, (3, 3, 3, 3))
    dn = lax.conv_dimension_numbers(x.shape, w_x.shape, ("NCHW", "OIHW", "NCHW"))
    gx = lax.conv_general_dilated(x, w_x, (1, 1), ((1, 1), (1, 1)),
                                  dimension_numbers=dn)
    gy = lax.conv_general_dilated(x, w_y, (1, 1), ((1, 1), (1, 1)),
                                  dimension_numbers=dn)
    return gx, gy


if __name__ == "__main__":
    k0, k1 = jax.random.split(jax.random.PRNGKey(0))

    # Case 1: default auto block size.
    x = jax.random.normal(k0, (2, 3, 16, 16), dtype=jnp.float32)
    gx, gy = jax.block_until_ready(image_gradient(x))
    gx_ref, gy_ref = _reference(x)
    assert jnp.allclose(gx, gx_ref, atol=1e-4, rtol=1e-4)
    assert jnp.allclose(gy, gy_ref, atol=1e-4, rtol=1e-4)

    # Case 2: non-divisible batch with forced block -> exercises the masked ragged tail.
    x2 = jax.random.normal(k1, (3, 3, 16, 16), dtype=jnp.float32)
    gx2, gy2 = jax.block_until_ready(image_gradient(x2, batch_block=2))
    gx2_ref, gy2_ref = _reference(x2)
    assert jnp.allclose(gx2, gx2_ref, atol=1e-4, rtol=1e-4)
    assert jnp.allclose(gy2, gy2_ref, atol=1e-4, rtol=1e-4)

    print("KERNEL_OK")
</pallas_src>

<mosaic_0001>
module attributes {stable_mosaic.version = 11 : i64} {
  func.func @_image_gradient_kernel(%arg0: i32, %arg1: memref<1x3x16x16xf32, #tpu.memory_space<vmem>>, %arg2: memref<1x3x16x16xf32, #tpu.memory_space<vmem>>, %arg3: memref<1x3x16x16xf32, #tpu.memory_space<vmem>>, %arg4: memref<1x18x18xf32, #tpu.memory_space<vmem>>) attributes {dimension_semantics = [#tpu.dimension_semantics<parallel>], iteration_bounds = array<i64: 2>, scalar_prefetch = 0 : i64, scratch_operands = 1 : i64, tpu.core_type = #tpu.core_type<tc>, window_params = [{transform_indices = @transform_0, window_bounds = array<i64: 1, 3, 16, 16>}, {transform_indices = @transform_1, window_bounds = array<i64: 1, 3, 16, 16>}, {transform_indices = @transform_2, window_bounds = array<i64: 1, 3, 16, 16>}]} {
    %c0 = arith.constant 0 : index
    %c0_0 = arith.constant 0 : index
    %c0_1 = arith.constant 0 : index
    %c0_2 = arith.constant 0 : index
    %0 = vector.load %arg1[%c0, %c0_0, %c0_1, %c0_2] : memref<1x3x16x16xf32, #tpu.memory_space<vmem>>, vector<1x3x16x16xf32>
    %cst = arith.constant dense<0.000000e+00> : vector<1x16x16xf32>
    %1 = vector.multi_reduction <add>, %0, %cst [1] : vector<1x3x16x16xf32> to vector<1x16x16xf32>
    %cst_3 = arith.constant 0.000000e+00 : f32
    %2 = vector.broadcast %cst_3 : f32 to vector<1x1x18xf32>
    %c0_4 = arith.constant 0 : index
    %c0_5 = arith.constant 0 : index
    %c0_6 = arith.constant 0 : index
    %3 = vector.load %arg4[%c0_4, %c0_5, %c0_6] : memref<1x18x18xf32, #tpu.memory_space<vmem>>, vector<1x1x18xf32>
    tpu.vector_store %arg4[%c0_4, %c0_5, %c0_6], %2 {strides = array<i32>} : memref<1x18x18xf32, #tpu.memory_space<vmem>>, vector<1x1x18xf32>,
    %cst_7 = arith.constant 0.000000e+00 : f32
    %4 = vector.broadcast %cst_7 : f32 to vector<1x1x18xf32>
    %c0_8 = arith.constant 0 : index
    %c17 = arith.constant 17 : index
    %c0_9 = arith.constant 0 : index
    %5 = vector.load %arg4[%c0_8, %c17, %c0_9] : memref<1x18x18xf32, #tpu.memory_space<vmem>>, vector<1x1x18xf32>
    tpu.vector_store %arg4[%c0_8, %c17, %c0_9], %4 {strides = array<i32>} : memref<1x18x18xf32, #tpu.memory_space<vmem>>, vector<1x1x18xf32>,
    %cst_10 = arith.constant 0.000000e+00 : f32
    %6 = vector.broadcast %cst_10 : f32 to vector<1x18x1xf32>
    %c0_11 = arith.constant 0 : index
    %c0_12 = arith.constant 0 : index
    %c0_13 = arith.constant 0 : index
    %7 = vector.load %arg4[%c0_11, %c0_12, %c0_13] : memref<1x18x18xf32, #tpu.memory_space<vmem>>, vector<1x18x1xf32>
    tpu.vector_store %arg4[%c0_11, %c0_12, %c0_13], %6 {strides = array<i32>} : memref<1x18x18xf32, #tpu.memory_space<vmem>>, vector<1x18x1xf32>,
    %cst_14 = arith.constant 0.000000e+00 : f32
    %8 = vector.broadcast %cst_14 : f32 to vector<1x18x1xf32>
    %c0_15 = arith.constant 0 : index
    %c0_16 = arith.constant 0 : index
    %c17_17 = arith.constant 17 : index
    %9 = vector.load %arg4[%c0_15, %c0_16, %c17_17] : memref<1x18x18xf32, #tpu.memory_space<vmem>>, vector<1x18x1xf32>
    tpu.vector_store %arg4[%c0_15, %c0_16, %c17_17], %8 {strides = array<i32>} : memref<1x18x18xf32, #tpu.memory_space<vmem>>, vector<1x18x1xf32>,
    %c0_18 = arith.constant 0 : index
    %c1 = arith.constant 1 : index
    %c1_19 = arith.constant 1 : index
    %10 = vector.load %arg4[%c0_18, %c1, %c1_19] : memref<1x18x18xf32, #tpu.memory_space<vmem>>, vector<1x16x16xf32>
    tpu.vector_store %arg4[%c0_18, %c1, %c1_19], %1 {strides = array<i32>} : memref<1x18x18xf32, #tpu.memory_space<vmem>>, vector<1x16x16xf32>,
    %c0_20 = arith.constant 0 : index
    %c0_21 = arith.constant 0 : index
    %c0_22 = arith.constant 0 : index
    %11 = vector.load %arg4[%c0_20, %c0_21, %c0_22] : memref<1x18x18xf32, #tpu.memory_space<vmem>>, vector<1x16x18xf32>
    %c0_23 = arith.constant 0 : index
    %c1_24 = arith.constant 1 : index
    %c0_25 = arith.constant 0 : index
    %12 = vector.load %arg4[%c0_23, %c1_24, %c0_25] : memref<1x18x18xf32, #tpu.memory_space<vmem>>, vector<1x16x18xf32>
    %c0_26 = arith.constant 0 : index
    %c2 = arith.constant 2 : index
    %c0_27 = arith.constant 0 : index
    %13 = vector.load %arg4[%c0_26, %c2, %c0_27] : memref<1x18x18xf32, #tpu.memory_space<vmem>>, vector<1x16x18xf32>
    %cst_28 = arith.constant 2.000000e+00 : f32
    %14 = vector.broadcast %cst_28 : f32 to vector<1x16x18xf32>
    %15 = arith.mulf %14, %12 : vector<1x16x18xf32>
    %16 = arith.addf %11, %15 : vector<1x16x18xf32>
    %17 = arith.addf %16, %13 : vector<1x16x18xf32>
    %18 = arith.subf %11, %13 : vector<1x16x18xf32>
    %19 = vector.extract_strided_slice %17 {offsets = [0, 0, 0], sizes = [1, 16, 16], strides = [1, 1, 1]} : vector<1x16x18xf32> to vector<1x16x16xf32>
    %20 = vector.extract_strided_slice %17 {offsets = [0, 0, 2], sizes = [1, 16, 16], strides = [1, 1, 1]} : vector<1x16x18xf32> to vector<1x16x16xf32>
    %21 = arith.subf %19, %20 : vector<1x16x16xf32>
    %22 = vector.extract_strided_slice %18 {offsets = [0, 0, 0], sizes = [1, 16, 16], strides = [1, 1, 1]} : vector<1x16x18xf32> to vector<1x16x16xf32>
    %23 = vector.extract_strided_slice %18 {offsets = [0, 0, 1], sizes = [1, 16, 16], strides = [1, 1, 1]} : vector<1x16x18xf32> to vector<1x16x16xf32>
    %cst_29 = arith.constant 2.000000e+00 : f32
    %24 = vector.broadcast %cst_29 : f32 to vector<1x16x16xf32>
    %25 = arith.mulf %24, %23 : vector<1x16x16xf32>
    %26 = arith.addf %22, %25 : vector<1x16x16xf32>
    %27 = vector.extract_strided_slice %18 {offsets = [0, 0, 2], sizes = [1, 16, 16], strides = [1, 1, 1]} : vector<1x16x18xf32> to vector<1x16x16xf32>
    %28 = arith.addf %26, %27 : vector<1x16x16xf32>
    %c0_30 = arith.constant 0 : index
    %c0_31 = arith.constant 0 : index
    %c0_32 = arith.constant 0 : index
    %c0_33 = arith.constant 0 : index
    %29 = vector.load %arg2[%c0_30, %c0_31, %c0_32, %c0_33] : memref<1x3x16x16xf32, #tpu.memory_space<vmem>>, vector<1x1x16x16xf32>
    %30 = vector.shape_cast %29 : vector<1x1x16x16xf32> to vector<1x16x16xf32>
    %31 = vector.shape_cast %21 : vector<1x16x16xf32> to vector<1x1x16x16xf32>
    tpu.vector_store %arg2[%c0_30, %c0_31, %c0_32, %c0_33], %31 {strides = array<i32>} : memref<1x3x16x16xf32, #tpu.memory_space<vmem>>, vector<1x1x16x16xf32>,
    %c0_34 = arith.constant 0 : index
    %c0_35 = arith.constant 0 : index
    %c0_36 = arith.constant 0 : index
    %c0_37 = arith.constant 0 : index
    %32 = vector.load %arg3[%c0_34, %c0_35, %c0_36, %c0_37] : memref<1x3x16x16xf32, #tpu.memory_space<vmem>>, vector<1x1x16x16xf32>
    %33 = vector.shape_cast %32 : vector<1x1x16x16xf32> to vector<1x16x16xf32>
    %34 = vector.shape_cast %28 : vector<1x16x16xf32> to vector<1x1x16x16xf32>
    tpu.vector_store %arg3[%c0_34, %c0_35, %c0_36, %c0_37], %34 {strides = array<i32>} : memref<1x3x16x16xf32, #tpu.memory_space<vmem>>, vector<1x1x16x16xf32>,
    %c0_38 = arith.constant 0 : index
    %c1_39 = arith.constant 1 : index
    %c0_40 = arith.constant 0 : index
    %c0_41 = arith.constant 0 : index
    %35 = vector.load %arg2[%c0_38, %c1_39, %c0_40, %c0_41] : memref<1x3x16x16xf32, #tpu.memory_space<vmem>>, vector<1x1x16x16xf32>
    %36 = vector.shape_cast %35 : vector<1x1x16x16xf32> to vector<1x16x16xf32>
    %37 = vector.shape_cast %21 : vector<1x16x16xf32> to vector<1x1x16x16xf32>
    tpu.vector_store %arg2[%c0_38, %c1_39, %c0_40, %c0_41], %37 {strides = array<i32>} : memref<1x3x16x16xf32, #tpu.memory_space<vmem>>, vector<1x1x16x16xf32>,
    %c0_42 = arith.constant 0 : index
    %c1_43 = arith.constant 1 : index
    %c0_44 = arith.constant 0 : index
    %c0_45 = arith.constant 0 : index
    %38 = vector.load %arg3[%c0_42, %c1_43, %c0_44, %c0_45] : memref<1x3x16x16xf32, #tpu.memory_space<vmem>>, vector<1x1x16x16xf32>
    %39 = vector.shape_cast %38 : vector<1x1x16x16xf32> to vector<1x16x16xf32>
    %40 = vector.shape_cast %28 : vector<1x16x16xf32> to vector<1x1x16x16xf32>
    tpu.vector_store %arg3[%c0_42, %c1_43, %c0_44, %c0_45], %40 {strides = array<i32>} : memref<1x3x16x16xf32, #tpu.memory_space<vmem>>, vector<1x1x16x16xf32>,
    %c0_46 = arith.constant 0 : index
    %c2_47 = arith.constant 2 : index
    %c0_48 = arith.constant 0 : index
    %c0_49 = arith.constant 0 : index
    %41 = vector.load %arg2[%c0_46, %c2_47, %c0_48, %c0_49] : memref<1x3x16x16xf32, #tpu.memory_space<vmem>>, vector<1x1x16x16xf32>
    %42 = vector.shape_cast %41 : vector<1x1x16x16xf32> to vector<1x16x16xf32>
    %43 = vector.shape_cast %21 : vector<1x16x16xf32> to vector<1x1x16x16xf32>
    tpu.vector_store %arg2[%c0_46, %c2_47, %c0_48, %c0_49], %43 {strides = array<i32>} : memref<1x3x16x16xf32, #tpu.memory_space<vmem>>, vector<1x1x16x16xf32>,
    %c0_50 = arith.constant 0 : index
    %c2_51 = arith.constant 2 : index
    %c0_52 = arith.constant 0 : index
    %c0_53 = arith.constant 0 : index
    %44 = vector.load %arg3[%c0_50, %c2_51, %c0_52, %c0_53] : memref<1x3x16x16xf32, #tpu.memory_space<vmem>>, vector<1x1x16x16xf32>
    %45 = vector.shape_cast %44 : vector<1x1x16x16xf32> to vector<1x16x16xf32>
    %46 = vector.shape_cast %28 : vector<1x16x16xf32> to vector<1x1x16x16xf32>
    tpu.vector_store %arg3[%c0_50, %c2_51, %c0_52, %c0_53], %46 {strides = array<i32>} : memref<1x3x16x16xf32, #tpu.memory_space<vmem>>, vector<1x1x16x16xf32>,
    return
  }
  func.func @transform_0(%arg0: i32) -> (i32, i32, i32, i32) {
    %c0_i32 = arith.constant 0 : i32
    %c0_i32_0 = arith.constant 0 : i32
    %c0_i32_1 = arith.constant 0 : i32
    %c0_i32_2 = arith.constant 0 : i32
    return %arg0, %c0_i32, %c0_i32_0, %c0_i32_1 : i32, i32, i32, i32
  }
  func.func @transform_1(%arg0: i32) -> (i32, i32, i32, i32) {
    %c0_i32 = arith.constant 0 : i32
    %c0_i32_0 = arith.constant 0 : i32
    %c0_i32_1 = arith.constant 0 : i32
    %c0_i32_2 = arith.constant 0 : i32
    return %arg0, %c0_i32, %c0_i32_0, %c0_i32_1 : i32, i32, i32, i32
  }
  func.func @transform_2(%arg0: i32) -> (i32, i32, i32, i32) {
    %c0_i32 = arith.constant 0 : i32
    %c0_i32_0 = arith.constant 0 : i32
    %c0_i32_1 = arith.constant 0 : i32
    %c0_i32_2 = arith.constant 0 : i32
    return %arg0, %c0_i32, %c0_i32_0, %c0_i32_1 : i32, i32, i32, i32
  }
}

</mosaic_0001>

<bundles_post_ra>
// kernel: tpu_custom_call.1
= control target key start
LH: loop header
LB: loop body
LE: loop exit
PB: predicated region body
PF: predicated region fallthrough
CT: control target
= control target key end

     0   :  { %8 = vsyncpa [#allocation4], 0  ;;  %s882_s0 = inlined_call_operand.hbm [shape: f32[2,3,16,16], index: 0, kind: input, shape index: {}]   ;;  %s883_s1 = inlined_call_operand.hbm [shape: f32[2,3,16,16], index: 1, kind: output, shape index: {0}]   ;;  %s884_s2 = inlined_call_operand.hbm [shape: f32[2,3,16,16], index: 2, kind: output, shape index: {1}]  }
   0x1   :  { %10 = vsyncpa [#allocation4 + $0x1], 0 }
   0x2   :  { %11 = vsyncpa [#allocation5], 0 }
   0x3   :  { %13 = vsyncpa [#allocation5 + $0x1], 0 }
   0x4   :  { %14 = vsyncpa [#allocation8], 0 }
   0x5   :  { %16 = vsyncpa [#allocation8 + $0x1], 0  ;;  %s653_s9 = smov 0   ;;  %s655_s10 = smov 0  }
   0x6   :  { %s657_s11 = smov 0   ;;  %s659_s12 = smov 0  }
   0x7 LB: > { %s674_s13 = sadd.s32 4294967295, %s625_s12   ;;  %s416_s14 = sadd.s32 4294967294, %s625_s12   ;;  %s625_s12 = sphi %s659_s12, %s896_s12   ;;  %s621_s11 = sphi %s657_s11, %s895_s11   ;;  %s617_s10 = sphi %s655_s10, %s894_s10   ;;  %s613_s9 = sphi %s653_s9, %s893_s9  }
   0x8   : > { %s678_s15 = sadd.s32 1, %s625_s12   ;;  %s29_s16 = sadd.s32 1, %s621_s11 }
   0x9   : > { %s26_s17 = ssub.s32 %s625_s12, %s678_s15  ;;  %p36_p0 = scmp.ne.s32.totalorder %s621_s11, %s617_s10 }
   0xa   : > { %p27_p1 = scmp.eq.s32.totalorder %s26_s17, 0  ;;  %p37_p2 = scmp.eq.s32.totalorder %s625_s12, 0 }
   0xb   : > { %p42_p3 = scmp.ne.s32.totalorder %s617_s10, %s613_s9  ;;  %p43_p4 = scmp.eq.s32.totalorder %s674_s13, 0 }
   0xc   : > { %s690_s18 = scalar_select %p27_p1, %s621_s11, %s29_s16  }
   0xd   : > { %p38_p5 = por %p37_p2, %p36_p0  ;;  %p692_p6 = por %p43_p4, %p42_p3 }
   0xe   : > { %p66_p7 = scmp.eq.s32.totalorder %s674_s13, 1  ;;  %p72_p8 = scmp.eq.s32.totalorder %s416_s14, 1 }
   0xf   : > { %p455_p10 = scmp.lt.s32.totalorder %s625_s12, 2  ;;  %s118_s22 = sand.u32 1, %s621_s11  }
  0x10   : > { %p699_p11 = por %p66_p7, %p36_p0  ;;  %p703_p12 = por %p72_p8, %p42_p3 }
  0x11   : > { %s434_s23 = smul.u32 768, %s625_s12  ;;  %p714_p13 = pnand %p455_p10, %p38_p5 }
  0x12   : > { %s887_s20 = scalar_select %p699_p11, 1, 0 }
  0x13   : > { %s888_s21 = scalar_select %p703_p12, 1, 0 }
  0x14   : > { %s433_s24 = smul.u32 48, %s118_s22  ;;  %s712_s27 = scalar_lea.hbm %s882_s0, %s434_s23 }
  0x15   : > { %s720_s3 = scalar_lea.sflag [#allocation4], %s118_s22  ;;  %s497_s4 = scalar_lea.hbm %s712_s27, 768 }
  0x16   : > { %s122_s29 = scalar_lea.vmem [#allocation3], %s433_s24  ;;  %p498_p0 = scmp.ne.s32.totalorder %s712_s27, %s497_s4 }
  0x17   : > { %s129_s30 = sshll.u32 %s122_s29, 4  ;;  %p499_p1 = pneg %p714_p13  ;;  %s718_s30 = int_to_ptr.vmem [resolvable:$true] %s129_s30 }
  0x18   : > { %s502_s7 = scalar_lea.hbm %s882_s0, 1536  ;;  %p503_p4 = scmp.lt.u32.totalorder %s712_s27, %s882_s0 }
  0x19   : > { %p500_p2 = pnand %p499_p1, %p498_p0  ;;  %p504_p5 = scmp.lt.u32.totalorder %s502_s7, %s497_s4 }
  0x1a   : > { %p506_p8 = scmp.lt.u32.totalorder %s497_s4, %s712_s27 }
  0x1b   : > { %p501_p3 = pneg %p500_p2  ;;  %p505_p7 = por %p504_p5, %p503_p4 }
  0x1d   : > { %p507_p10 = por %p506_p8, %p505_p7 }
  0x1f   : > { %p508_p9 = pnand %p507_p10, %p501_p3 }
  0x21   : > { %511 = shalt.err (!%p508_p9)
}
  0x22   : > { %s512_s16 = scalar_lea.vmem %s718_s30, 768  ;;  %s627_s17 = smov [#allocation3]  }
  0x23   : > { %p513_p0 = scmp.ne.s32.totalorder %s718_s30, %s512_s16  ;;  %s517_s22 = sshll.u32 %s627_s17, 4  ;;  %s518_s22 = int_to_ptr.vmem [resolvable:$false] %s517_s22 }
  0x24   : > { %s519_s23 = scalar_lea.vmem %s518_s22, 1536  ;;  %p520_p11 = scmp.lt.s32.totalorder %s718_s30, %s518_s22 }
  0x25   : > { %p515_p2 = pnand %p513_p0, %p499_p1  ;;  %p521_p4 = scmp.lt.s32.totalorder %s519_s23, %s512_s16 }
  0x27   : > { %p516_p12 = pneg %p515_p2  ;;  %p522_p5 = por %p521_p4, %p520_p11 }
  0x29   : > { %p523_p7 = pnand %p522_p5, %p516_p12 }
  0x2b   : > { %526 = shalt.err (!%p523_p7)
}
  0x2c   : > { %s628_s24 = smov 128   ;;  %s629_s25 = smov 8  }
  0x2d   : > { %447 = dma.hbm_to_vmem [thread:$0]  (!%p714_p13), %s712_s27, 768, %s718_s30, %s720_s3, %s628_s24, %s628_s24, %s629_s25  }
  0x2e   : > { %p420_p9 = scmp.ge.s32.totalorder %s625_s12, 1  ;;  %p137_p1 = scmp.lt.s32.totalorder %s625_s12, 3 }
  0x30   : > { %p138_p3 = pnand %p420_p9, %p137_p1 }
  0x31   : > { %s751_s26 = sand.u32 (!%p138_p3), 1, %s617_s10  }
  0x32   : > { %141 = sbr.rel (%p138_p3) target bundleno = 361 (0x169), region = 24  ;;  %s144_s4 = scalar_lea.sflag (!%p138_p3), [#allocation4], %s751_s26 }
  0x33   : > { %s754_s29 = smul.u32 (!%p138_p3), 48, %s751_s26 }
  0x35   : > { %s147_s5 = scalar_lea.vmem (!%p138_p3), [#allocation3], %s754_s29 }
  0x39   : > { %600 = dma.done.wait (%p692_p6), %s144_s4, 768  }
  0x3a   : > { %602 = vsyncadd (%p692_p6), %s144_s4, 4294966528  ;;  %vm190_vm0 = vcmask 139264   ;;  %vm193_vm1 = vcmask 7168   ;;  %v630_v0 = vmov 0.0   ;;  %vm198_vm2 = vcmask 146568   ;;  %v173_v1 = vld [vmem:[%s147_s5] sm:$0xff] }
  0x3b   : > { %191 = vst.msk [vmem:[#allocation2] sm:$0x1] %vm190_vm0, %v630_v0  ;;  %192 = vst.msk [vmem:[#allocation2 + $0x11] sm:$0x1] %vm190_vm0, %v630_v0  ;;  %vm196_vm3 = vcmask 1024   ;;  %vm201_vm4 = vcmask 140424  }
  0x3c   : > { %195 = vst.msk [vmem:[#allocation2 + $0x8] sm:$0xff] %vm193_vm1, %v630_v0  ;;  %194 = vst.msk [vmem:[#allocation2] sm:$0xff] %vm193_vm1, %v630_v0  ;;  %vm179_vm5 = vcmask 130048   ;;  %v175_v2 = vld [vmem:[%s147_s5 + $0x10] sm:$0xff]  ;;  %v177_v3 = vld [vmem:[%s147_s5 + $0x20] sm:$0xff]  ;;  %s631_s19 = smov 1  }
  0x3d   : > { %200 = vst.msk [vmem:[#allocation2 + $0x8] sm:$0xff] %vm198_vm2, %v630_v0  ;;  %199 = vst.msk [vmem:[#allocation2] sm:$0xff] %vm198_vm2, %v630_v0  ;;  %v180_v4 = vsel %vm179_vm5, %v173_v1, 0.0  ;;  %v181_v5 = vsel %vm179_vm5, %v175_v2, 0.0  ;;  %v183_v6 = vsel %vm179_vm5, %v177_v3, 0.0  ;;  %v174_v7 = vld [vmem:[%s147_s5 + $0x8] sm:$0xff] }
  0x3e   : > { %197 = vst.msk [vmem:[#allocation2 + $0x10] sm:$0x3] %vm196_vm3, %v630_v0  ;;  %v176_v8 = vld [vmem:[%s147_s5 + $0x18] sm:$0xff]  ;;  %v178_v9 = vld [vmem:[%s147_s5 + $0x28] sm:$0xff]  ;;  %v182_v10 = vadd.f32 %v181_v5, %v180_v4  ;;  %v185_v11 = vsel %vm179_vm5, %v174_v7, 0.0  ;;  %vm211_vm6 = vcmask 138248  }
  0x3f   : > { %202 = vst.msk [vmem:[#allocation2 + $0x10] sm:$0x3] %vm201_vm4, %v630_v0  ;;  %v186_v12 = vsel %vm179_vm5, %v176_v8, 0.0  ;;  %v188_v14 = vsel %vm179_vm5, %v178_v9, 0.0  ;;  %s632_s27 = smov 126   ;;  %s633_s28 = smov 127  }
  0x40   : > { %v187_v13 = vadd.f32 %v186_v12, %v185_v11  ;;  %v184_v15 = vadd.f32 %v183_v6, %v182_v10  ;;  %s165_s30 = scalar_lea.vmem [#allocation6], %s754_s29  ;;  %s773_s6 = scalar_lea.vmem [#allocation7], %s754_s29 }
  0x41   : > { %s295_s3 = sshll.u32 %s165_s30, 4  ;;  %s436_s7 = smul.u32 768, %s674_s13  ;;  %s782_s3 = int_to_ptr.vmem [resolvable:$true] %s295_s3 }
  0x42   : > { %205 = vrot.lane.b32.xlu0 %v184_v15, %s631_s19  ;;  %v189_v16 = vadd.f32 %v188_v14, %v187_v13  ;;  %s311_s8 = sshll.u32 %s773_s6, 4  ;;  %s277_s22 = scalar_lea.sflag [#allocation5], %s751_s26  ;;  %s792_s8 = int_to_ptr.vmem [resolvable:$true] %s311_s8 }
  0x43   : > { %s790_s17 = scalar_lea.hbm %s883_s1, %s436_s7  ;;  %s527_s23 = scalar_lea.vmem %s782_s3, 768 }
  0x44   : > { %p528_p6 = scmp.ne.s32.totalorder %s782_s3, %s527_s23  ;;  %p890_p11 = scmp.ne.s32.totalorder %s887_s20, 0 }
  0x45   : > { %s634_s24 = smov [#allocation6]  }
  0x46   : > { %207 = vrot.lane.b32.xlu0 %v189_v16, %s631_s19  ;;  %p529_p12 = pnand %p528_p6, %p890_p11  ;;  %s531_s25 = sshll.u32 %s634_s24, 4  ;;  %s532_s25 = int_to_ptr.vmem [resolvable:$false] %s531_s25 }
  0x47   : > { %s533_s29 = scalar_lea.vmem %s532_s25, 1536  ;;  %p534_p8 = scmp.lt.s32.totalorder %s782_s3, %s532_s25 }
  0x48   : > { %p530_p13 = pneg %p529_p12  ;;  %p535_p10 = scmp.lt.s32.totalorder %s533_s29, %s527_s23 }
  0x4a   : > { %p536_p0 = por %p535_p10, %p534_p8 }
  0x4c   : > { %p537_p2 = pnand %p536_p0, %p530_p13 }
  0xb4   : > { %v206_v17 = vpop.permute.xlu0 %205 }
  0xb5   : > { %212 = vst.msk [vmem:[#allocation2 + $0x1] sm:$0xff] %vm211_vm6, %v206_v17 }
  0xb8   : > { %v208_v18 = vpop.permute.xlu0 %207 }
  0xb9   : > { %213 = vst.msk [vmem:[#allocation2 + $0x9] sm:$0xff] %vm211_vm6, %v208_v18 }
  0xbc   : > { %v216_v19 = vld [vmem:[#allocation2 + $0x1] sm:$0xff] }
  0xbd   : > { %v220_v20 = vmul.f32 2.0, %v216_v19  ;;  %v214_v21 = vld [vmem:[#allocation2] sm:$0xff] }
  0xbf   : > { %v222_v22 = vadd.f32 %v220_v20, %v214_v21 }
  0xc0   : > { %v218_v23 = vld [vmem:[#allocation2 + $0x2] sm:$0xff]  ;;  %v219_v25 = vld [vmem:[#allocation2 + $0xa] sm:$0xff] }
  0xc1   : > { %v215_v24 = vld [vmem:[#allocation2 + $0x8] sm:$0xff]  ;;  %v224_v26 = vadd.f32 %v222_v22, %v218_v23  ;;  %v226_v27 = vsub.f32 %v214_v21, %v218_v23 }
  0xc2   : > { %v217_v28 = vld [vmem:[#allocation2 + $0x9] sm:$0xff]  ;;  %v227_v30 = vsub.f32 %v215_v24, %v219_v25 }
  0xc3   : > { %230 = vrot.lane.b32.xlu0 %v224_v26, %s632_s27  ;;  %v238_v29 = vmul.f32 2.0, %v226_v27  ;;  %v221_v31 = vmul.f32 2.0, %v217_v28 }
  0xc4   : > { %v239_v32 = vmul.f32 2.0, %v227_v30 }
  0xc5   : > { %242 = vrot.lane.b32.xlu1 %v238_v29, %s633_s28  ;;  %v223_v33 = vadd.f32 %v221_v31, %v215_v24 }
  0xc7   : > { %252 = vrot.lane.b32.xlu0 %v226_v27, %s632_s27  ;;  %v225_v34 = vadd.f32 %v223_v33, %v219_v25 }
  0xc9   : > { %244 = vrot.lane.b32.xlu1 %v239_v32, %s633_s28 }
  0xcd   : > { %232 = vrot.lane.b32.xlu1 %v225_v34, %s632_s27 }
  0xd1   : > { %254 = vrot.lane.b32.xlu1 %v227_v30, %s632_s27 }
 0x135   : > { %v231_v35 = vpop.permute.xlu0 %230 }
 0x136   : > { %v236_v36 = vsub.f32 %v224_v26, %v231_v35 }
 0x137   : > { %v243_v37 = vpop.permute.xlu1 %242 }
 0x138   : > { %260 = vst.msk [vmem:[%s165_s30] sm:$0xff] %vm179_vm5, %v236_v36  ;;  %421 = vst.msk [vmem:[%s165_s30 + $0x10] sm:$0xff] %vm179_vm5, %v236_v36  ;;  %v248_v38 = vadd.f32 %v243_v37, %v226_v27 }
 0x139   : > { %425 = vst.msk [vmem:[%s165_s30 + $0x20] sm:$0xff] %vm179_vm5, %v236_v36  ;;  %v253_v39 = vpop.permute.xlu0 %252 }
 0x13a   : > { %v258_v40 = vadd.f32 %v253_v39, %v248_v38 }
 0x13b   : > { %v245_v41 = vpop.permute.xlu1 %244 }
 0x13c   : > { %262 = vst.msk [vmem:[%s773_s6] sm:$0xff] %vm179_vm5, %v258_v40  ;;  %423 = vst.msk [vmem:[%s773_s6 + $0x10] sm:$0xff] %vm179_vm5, %v258_v40  ;;  %v249_v44 = vadd.f32 %v245_v41, %v227_v30 }
 0x13d   : > { %427 = vst.msk [vmem:[%s773_s6 + $0x20] sm:$0xff] %vm179_vm5, %v258_v40 }
 0x13f   : > { %v233_v42 = vpop.permute.xlu1 %232 }
 0x140   : > { %v237_v43 = vsub.f32 %v225_v34, %v233_v42 }
 0x142   : > { %261 = vst.msk [vmem:[%s165_s30 + $0x8] sm:$0xff] %vm179_vm5, %v237_v43  ;;  %422 = vst.msk [vmem:[%s165_s30 + $0x18] sm:$0xff] %vm179_vm5, %v237_v43 }
 0x143   : > { %426 = vst.msk [vmem:[%s165_s30 + $0x28] sm:$0xff] %vm179_vm5, %v237_v43  ;;  %v255_v45 = vpop.permute.xlu1 %254 }
 0x144   : > { %540 = shalt.err (!%p537_p2)
}
 0x145   : > { %s541_s4 = scalar_lea.hbm %s790_s17, 768  ;;  %s545_s27 = scalar_lea.hbm %s883_s1, 1536 }
 0x146   : > { %p542_p4 = scmp.ne.s32.totalorder %s790_s17, %s541_s4  ;;  %p546_p9 = scmp.lt.u32.totalorder %s790_s17, %s883_s1 }
 0x147   : > { %p547_p1 = scmp.lt.u32.totalorder %s545_s27, %s541_s4  ;;  %p549_p6 = scmp.lt.u32.totalorder %s541_s4, %s790_s17 }
 0x148   : > { %p543_p5 = pnand %p542_p4, %p890_p11 }
 0x149   : > { %p548_p3 = por %p547_p1, %p546_p9 }
 0x14a   : > { %p544_p7 = pneg %p543_p5 }
 0x14b   : > { %p550_p12 = por %p549_p6, %p548_p3 }
 0x14d   : > { %p551_p13 = pnand %p550_p12, %p544_p7 }
 0x14f   : > { %554 = shalt.err (!%p551_p13)
}
 0x150   : > { %s635_s14 = smov 128   ;;  %s636_s16 = smov 8   ;;  %v259_v46 = vadd.f32 %v255_v45, %v249_v44 }
 0x151   : > { %440 = dma.vmem_to_hbm [thread:$0]  (%p890_p11), %s782_s3, 768, %s790_s17, %s277_s22, %s635_s14, %s635_s14, %s636_s16  }
 0x152   : > { %s829_s25 = scalar_lea.hbm %s884_s2, %s436_s7  ;;  %263 = vst.msk [vmem:[%s773_s6 + $0x8] sm:$0xff] %vm179_vm5, %v259_v46  ;;  %424 = vst.msk [vmem:[%s773_s6 + $0x18] sm:$0xff] %vm179_vm5, %v259_v46  ;;  %s282_s29 = scalar_lea.sflag [#allocation8], %s751_s26 }
 0x153   : > { %428 = vst.msk [vmem:[%s773_s6 + $0x28] sm:$0xff] %vm179_vm5, %v259_v46  ;;  %s555_s4 = scalar_lea.vmem %s792_s8, 768  ;;  %s637_s3 = smov [#allocation7]  }
 0x154   : > { %p556_p8 = scmp.ne.s32.totalorder %s792_s8, %s555_s4  ;;  %s559_s17 = sshll.u32 %s637_s3, 4  ;;  %s560_s17 = int_to_ptr.vmem [resolvable:$false] %s559_s17 }
 0x155   : > { %s561_s13 = scalar_lea.vmem %s560_s17, 1536  ;;  %p562_p2 = scmp.lt.s32.totalorder %s792_s8, %s560_s17 }
 0x156   : > { %p557_p10 = pnand %p556_p8, %p890_p11  ;;  %p563_p4 = scmp.lt.s32.totalorder %s561_s13, %s555_s4 }
 0x158   : > { %p558_p0 = pneg %p557_p10  ;;  %p564_p5 = por %p563_p4, %p562_p2 }
 0x15a   : > { %p565_p7 = pnand %p564_p5, %p558_p0 }
 0x15c   : > { %568 = shalt.err (!%p565_p7)
}
 0x15d   : > { %s569_s6 = scalar_lea.hbm %s829_s25, 768  ;;  %s573_s5 = scalar_lea.hbm %s884_s2, 1536 }
 0x15e   : > { %p570_p9 = scmp.ne.s32.totalorder %s829_s25, %s569_s6  ;;  %p574_p6 = scmp.lt.u32.totalorder %s829_s25, %s884_s2 }
 0x15f   : > { %p575_p12 = scmp.lt.u32.totalorder %s573_s5, %s569_s6  ;;  %p577_p8 = scmp.lt.u32.totalorder %s569_s6, %s829_s25 }
 0x160   : > { %p571_p1 = pnand %p570_p9, %p890_p11 }
 0x161   : > { %p576_p13 = por %p575_p12, %p574_p6 }
 0x162   : > { %p572_p3 = pneg %p571_p1 }
 0x163   : > { %p578_p10 = por %p577_p8, %p576_p13 }
 0x165   : > { %p579_p0 = pnand %p578_p10, %p572_p3 }
 0x167   : > { %582 = shalt.err (!%p579_p0)
}
 0x168   : > { %441 = dma.vmem_to_hbm [thread:$0]  (%p890_p11), %s792_s8, 768, %s829_s25, %s282_s29, %s635_s14, %s635_s14, %s636_s16  }
 0x169 PF: > { %s326_s28 = sand.u32 1, %s613_s9   ;;  %p891_p2 = scmp.ne.s32.totalorder %s888_s21, 0 }
 0x16a   : > { %p892_p4 = scmp.ge.s32.totalorder %s625_s12, 2  ;;  %s327_s30 = scalar_lea.sflag [#allocation5], %s326_s28 }
 0x16c   : > { %p449_p5 = pnand %p892_p4, %p891_p2 }
 0x16e   : > { %604 = dma.done.wait (!%p449_p5), %s327_s30, 768  }
 0x16f   : > { %606 = vsyncadd (!%p449_p5), %s327_s30, 4294966528  ;;  %s336_s20 = scalar_lea.sflag [#allocation8], %s326_s28 }
 0x170   : > { %608 = dma.done.wait (!%p449_p5), %s336_s20, 768  }
 0x171   : > { %610 = vsyncadd (!%p449_p5), %s336_s20, 4294966528  ;;  %p19_p11 = scmp.ge.s32.totalorder %s678_s15, 4   ;;  %s893_s9 = smov %s617_s10 }
 0x172   : > { %s894_s10 = smov %s621_s11  ;;  %s895_s11 = smov %s690_s18 }
 0x173   : > { %s896_s12 = smov %s678_s15  ;;  %21 = sbr.rel (!%p19_p11) target bundleno = 7 (0x7), region = 90 }
 0x17a   :  { %341 = vsyncpa [#allocation4], 1 }
 0x17b   :  { %343 = vsyncpa [#allocation4 + $0x1], 1 }
 0x17c   :  { %344 = vsyncpa [#allocation5], 1 }
 0x17d   :  { %346 = vsyncpa [#allocation5 + $0x1], 1 }
 0x17e   :  { %347 = vsyncpa [#allocation8], 1 }
 0x17f   :  { %349 = vsyncpa [#allocation8 + $0x1], 1 }

</bundles_post_ra>
